<compile_context>
chip_gen: v7x
topology: tpu7x:2x2x1
jax: 0.10.0
libtpu: 0.0.40
codegen_flags: <defaults>
</compile_context>

<pallas_src>
import jax
import jax.numpy as jnp
import numpy as np
from jax.experimental import pallas as pl
from jax.experimental.pallas import tpu as pltpu


def _round_up(x, m):
    return (x + m - 1) // m * m


def _vmem_capacity_bytes():
    try:
        return int(pltpu.get_tpu_info().vmem_capacity_bytes)
    except Exception:
        return 64 * 1024 * 1024  # conservative: v7x per-TensorCore VMEM


def _pick_tiling(n, ho, wo, w, cin, cout, budget_bytes, min_steps=8):
    """Choose TH (output rows per grid step). Returns (TH, pad_output_lanes)."""
    cands = []
    for th in range(1, ho + 1):
        if ho % th:
            continue
        l, tp = 2 * th * w, th * wo
        if (l % 128) and th != ho:          # input block lane rule (last dim)
            continue
        streamed = (2 * cin * l * 4         # x block, double buffered, f32
                    + 2 * cout * tp * 4     # out block, double buffered, f32
                    + 2 * l * tp * 2        # pooling matrix, bf16
                    + cin * l * 4           # BN+ReLU intermediate, f32
                    + cin * tp * 4          # pooled intermediate, f32
                    + cout * cin * 2)       # conv weight, bf16
        cands.append(dict(th=th, aligned=(tp % 128 == 0),
                          fits=(streamed <= budget_bytes),
                          steps=n * (ho // th)))

    aligned_fit = [c for c in cands if c['aligned'] and c['fits']]
    if aligned_fit:
        pref = [c for c in aligned_fit if c['steps'] >= min_steps]
        return max(c['th'] for c in (pref or aligned_fit)), False

    fit = [c for c in cands if c['fits']]
    if fit:
        th = max(c['th'] for c in fit)
        # Single spatial tile per image -> pad output lanes to 128 (zero cols
        # in the pooling matrix, sliced off in the wrapper).  Otherwise accept
        # masked output stores (correct, just slower; rare fallback).
        return th, (th == ho)

    return min(c['th'] for c in cands), False


def _pooling_matrix(th, w, wo, tp_out):
    """(2*TH*W, tp_out) bf16 matrix doing the full 2x2 mean (0.25 folded in)."""
    l = 2 * th * w
    f = np.arange(l)
    r, c = f // w, f % w
    o = (r // 2) * wo + (c // 2)
    m = np.zeros((l, tp_out), np.float32)
    m[f, o] = 0.25
    return jnp.asarray(m, dtype=jnp.bfloat16)


def _transition_kernel(x_ref, scale_ref, shift_ref, pool_ref, w_ref, o_ref):
    # x_ref:       (1, Cin, L)   f32 lane-dense flattened NCHW slice (L = 2*TH*W)
    # scale/shift: (Cin, 1)      folded BatchNorm affine
    # pool_ref:    (L, TP)       bf16 block-structured 2x2 average-pooling matrix
    # w_ref:       (Cout, Cin)   bf16 1x1 conv weight
    # o_ref:       (1, Cout, TP) f32 output tile (already NCHW order)
    y = jnp.maximum(x_ref[0] * scale_ref[...] + shift_ref[...], 0.0)    # VPU, f32
    pooled = jnp.dot(y.astype(jnp.bfloat16), pool_ref[...],
                     preferred_element_type=jnp.float32)                # (Cin, TP)
    z = jnp.dot(w_ref[...], pooled.astype(jnp.bfloat16),
                preferred_element_type=jnp.float32)                     # (Cout, TP)
    o_ref[0] = z.astype(o_ref.dtype)


def densenet_transition(x_nchw, gamma, beta, conv_w, eps=1e-5):
    """x_nchw: (N, Cin, H, W) float32; conv_w: (Cout, Cin) (1x1 conv weight squeezed)."""
    N, Cin, H, W = x_nchw.shape
    Cout = conv_w.shape[0]
    assert H % 2 == 0 and W % 2 == 0
    Ho, Wo = H // 2, W // 2
    P = Ho * Wo

    vmem_cap = _vmem_capacity_bytes()
    TH, pad_out = _pick_tiling(N, Ho, Wo, W, Cin, Cout, budget_bytes=vmem_cap // 5)
    n_tiles = Ho // TH
    L = 2 * TH * W
    TP = _round_up(TH * Wo, 128) if pad_out else TH * Wo
    P_out = n_tiles * TP

    x = x_nchw.astype(jnp.float32)

    # Training-mode BatchNorm2d batch statistics: one fused pass over x
    # (sum / sum-of-squares in f32, variance clamped >= 0 against cancellation),
    # folded into per-channel scale/shift.
    # TODO(synk): running_mean/running_var momentum updates are training-only
    # module state (no effect on this forward); eval mode would pass running
    # stats here instead of recomputing, saving one HBM pass over x.
    cnt = N * H * W
    mean = jnp.sum(x, axis=(0, 2, 3)) / cnt
    var = jnp.maximum(jnp.sum(x * x, axis=(0, 2, 3)) / cnt - mean * mean, 0.0)
    scale = gamma * jax.lax.rsqrt(var + eps)          # (Cin,)
    shift = beta - mean * scale                       # (Cin,)

    x_flat = x.reshape(N, Cin, H * W)                 # free: contiguous NCHW
    pool_m = _pooling_matrix(TH, W, Wo, TP)           # (L, TP) bf16
    w_bf = conv_w.reshape(Cout, Cin).astype(jnp.bfloat16)

    out = pl.pallas_call(
        _transition_kernel,
        out_shape=jax.ShapeDtypeStruct((N, Cout, P_out), jnp.float32),
        grid_spec=pltpu.PrefetchScalarGridSpec(
            num_scalar_prefetch=0,
            grid=(N, n_tiles),
            in_specs=[
                pl.BlockSpec((1, Cin, L), lambda n, t: (n, 0, t)),
                pl.BlockSpec((Cin, 1), lambda n, t: (0, 0)),
                pl.BlockSpec((Cin, 1), lambda n, t: (0, 0)),
                pl.BlockSpec((L, TP), lambda n, t: (0, 0)),
                pl.BlockSpec((Cout, Cin), lambda n, t: (0, 0)),
            ],
            out_specs=pl.BlockSpec((1, Cout, TP), lambda n, t: (n, 0, t)),
        ),
        compiler_params=pltpu.CompilerParams(
            dimension_semantics=("parallel", "parallel"),
            vmem_limit_bytes=min(64 * 1024 * 1024, int(vmem_cap * 0.6))),
    )(x_flat, scale.reshape(Cin, 1), shift.reshape(Cin, 1), pool_m, w_bf)

    if P_out != P:
        out = out[:, :, :P]                           # drop padded lanes
    # (N, Cout, Ho*Wo) is already NCHW order -> free reshape only.
    return out.reshape(N, Cout, Ho, Wo)


def _reference(x_nchw, gamma, beta, conv_w, eps=1e-5):
    """Plain-JAX reference matching the PyTorch forward (f32 throughout)."""
    x = x_nchw.astype(jnp.float32)
    mean = jnp.mean(x, axis=(0, 2, 3), keepdims=True)
    var = jnp.mean(jnp.square(x - mean), axis=(0, 2, 3), keepdims=True)
    xn = (x - mean) * jax.lax.rsqrt(var + eps)
    xn = xn * gamma[None, :, None, None] + beta[None, :, None, None]
    xn = jnp.maximum(xn, 0.0)
    y = jnp.einsum('nchw,oc->nohw', xn, conv_w)
    N, Co, H, W = y.shape
    y = y.reshape(N, Co, H // 2, 2, W // 2, 2).mean(axis=(3, 5))
    return y


if __name__ == "__main__":
    key = jax.random.PRNGKey(0)
    kx, kw, kg, kb = jax.random.split(key, 4)

    N, Cin, H, W = 2, 8, 16, 16          # DenseNet transition: halve channels
    Cout = 4

    x = jax.random.normal(kx, (N, Cin, H, W), dtype=jnp.float32)
    gamma = 1.0 + 0.1 * jax.random.normal(kg, (Cin,), dtype=jnp.float32)
    beta = 0.1 * jax.random.normal(kb, (Cin,), dtype=jnp.float32)
    # nn.Conv2d(in, out, 1, bias=False) weight (Cout, Cin, 1, 1) squeezed to (Cout, Cin).
    conv_w = (jax.random.normal(kw, (Cout, Cin), dtype=jnp.float32)
              * (1.0 / np.sqrt(Cin)))

    fn = jax.jit(densenet_transition)
    out = jax.block_until_ready(fn(x, gamma, beta, conv_w))
    ref = jax.block_until_ready(_reference(x, gamma, beta, conv_w))

    assert out.shape == (N, Cout, H // 2, W // 2), out.shape
    # bf16 MXU inputs (f32 accumulation) -> relaxed tolerance.
    np.testing.assert_allclose(np.asarray(out), np.asarray(ref), atol=2e-2, rtol=2e-2)
    print("KERNEL_OK")
</pallas_src>

<mosaic_0001>
module attributes {stable_mosaic.version = 11 : i64} {
  func.func @_transition_kernel(%arg0: i32, %arg1: i32, %arg2: memref<1x8x256xf32, #tpu.memory_space<vmem>>, %arg3: memref<8x1xf32, #tpu.memory_space<vmem>>, %arg4: memref<8x1xf32, #tpu.memory_space<vmem>>, %arg5: memref<256x128xbf16, #tpu.memory_space<vmem>>, %arg6: memref<4x8xbf16, #tpu.memory_space<vmem>>, %arg7: memref<1x4x128xf32, #tpu.memory_space<vmem>>) attributes {dimension_semantics = [#tpu.dimension_semantics<parallel>, #tpu.dimension_semantics<parallel>], iteration_bounds = array<i64: 2, 1>, scalar_prefetch = 0 : i64, scratch_operands = 0 : i64, tpu.core_type = #tpu.core_type<tc>, window_params = [{transform_indices = @transform_0, window_bounds = array<i64: 1, 8, 256>}, {pipeline_mode = #tpu.pipeline_mode<synchronous>, transform_indices = @transform_1, window_bounds = array<i64: 8, 1>}, {pipeline_mode = #tpu.pipeline_mode<synchronous>, transform_indices = @transform_2, window_bounds = array<i64: 8, 1>}, {pipeline_mode = #tpu.pipeline_mode<synchronous>, transform_indices = @transform_3, window_bounds = array<i64: 256, 128>}, {pipeline_mode = #tpu.pipeline_mode<synchronous>, transform_indices = @transform_4, window_bounds = array<i64: 4, 8>}, {transform_indices = @transform_5, window_bounds = array<i64: 1, 4, 128>}]} {
    %c0 = arith.constant 0 : index
    %c0_0 = arith.constant 0 : index
    %c0_1 = arith.constant 0 : index
    %0 = vector.load %arg2[%c0, %c0_0, %c0_1] : memref<1x8x256xf32, #tpu.memory_space<vmem>>, vector<1x8x256xf32>
    %1 = vector.shape_cast %0 : vector<1x8x256xf32> to vector<8x256xf32>
    %c0_2 = arith.constant 0 : index
    %c0_3 = arith.constant 0 : index
    %2 = vector.load %arg3[%c0_2, %c0_3] : memref<8x1xf32, #tpu.memory_space<vmem>>, vector<8x1xf32>
    %3 = vector.broadcast %2 : vector<8x1xf32> to vector<8x256xf32>
    %4 = arith.mulf %1, %3 : vector<8x256xf32>
    %c0_4 = arith.constant 0 : index
    %c0_5 = arith.constant 0 : index
    %5 = vector.load %arg4[%c0_4, %c0_5] : memref<8x1xf32, #tpu.memory_space<vmem>>, vector<8x1xf32>
    %6 = vector.broadcast %5 : vector<8x1xf32> to vector<8x256xf32>
    %7 = arith.addf %4, %6 : vector<8x256xf32>
    %cst = arith.constant 0.000000e+00 : f32
    %8 = vector.broadcast %cst : f32 to vector<8x256xf32>
    %9 = arith.maximumf %7, %8 : vector<8x256xf32>
    %10 = arith.truncf %9 : vector<8x256xf32> to vector<8x256xbf16>
    %c0_6 = arith.constant 0 : index
    %c0_7 = arith.constant 0 : index
    %11 = vector.load %arg5[%c0_6, %c0_7] : memref<256x128xbf16, #tpu.memory_space<vmem>>, vector<256x128xbf16>
    %cst_8 = arith.constant dense<0.000000e+00> : vector<8x128xf32>
    %12 = tpu.matmul %10, %11, %cst_8 {dimension_numbers = #tpu.dot_dimension_numbers<[1], [0], [0], [1], [0, 0, 1, 1], [], []>} : vector<8x256xbf16>, vector<256x128xbf16>, vector<8x128xf32> -> vector<8x128xf32>
    %c0_9 = arith.constant 0 : index
    %c0_10 = arith.constant 0 : index
    %13 = vector.load %arg6[%c0_9, %c0_10] : memref<4x8xbf16, #tpu.memory_space<vmem>>, vector<4x8xbf16>
    %14 = arith.truncf %12 : vector<8x128xf32> to vector<8x128xbf16>
    %cst_11 = arith.constant dense<0.000000e+00> : vector<4x128xf32>
    %15 = tpu.matmul %13, %14, %cst_11 {dimension_numbers = #tpu.dot_dimension_numbers<[1], [0], [0], [1], [0, 0, 1, 1], [], []>} : vector<4x8xbf16>, vector<8x128xbf16>, vector<4x128xf32> -> vector<4x128xf32>
    %c0_12 = arith.constant 0 : index
    %c0_13 = arith.constant 0 : index
    %c0_14 = arith.constant 0 : index
    %16 = vector.load %arg7[%c0_12, %c0_13, %c0_14] : memref<1x4x128xf32, #tpu.memory_space<vmem>>, vector<1x4x128xf32>
    %17 = vector.shape_cast %16 : vector<1x4x128xf32> to vector<4x128xf32>
    %18 = vector.shape_cast %15 : vector<4x128xf32> to vector<1x4x128xf32>
    tpu.vector_store %arg7[%c0_12, %c0_13, %c0_14], %18 {strides = array<i32>} : memref<1x4x128xf32, #tpu.memory_space<vmem>>, vector<1x4x128xf32>,
    return
  }
  func.func @transform_0(%arg0: i32, %arg1: i32) -> (i32, i32, i32) {
    %c0_i32 = arith.constant 0 : i32
    %c0_i32_0 = arith.constant 0 : i32
    return %arg0, %c0_i32, %arg1 : i32, i32, i32
  }
  func.func @transform_1(%arg0: i32, %arg1: i32) -> (i32, i32) {
    %c0_i32 = arith.constant 0 : i32
    %c0_i32_0 = arith.constant 0 : i32
    %c0_i32_1 = arith.constant 0 : i32
    return %c0_i32, %c0_i32_0 : i32, i32
  }
  func.func @transform_2(%arg0: i32, %arg1: i32) -> (i32, i32) {
    %c0_i32 = arith.constant 0 : i32
    %c0_i32_0 = arith.constant 0 : i32
    %c0_i32_1 = arith.constant 0 : i32
    return %c0_i32, %c0_i32_0 : i32, i32
  }
  func.func @transform_3(%arg0: i32, %arg1: i32) -> (i32, i32) {
    %c0_i32 = arith.constant 0 : i32
    %c0_i32_0 = arith.constant 0 : i32
    %c0_i32_1 = arith.constant 0 : i32
    return %c0_i32, %c0_i32_0 : i32, i32
  }
  func.func @transform_4(%arg0: i32, %arg1: i32) -> (i32, i32) {
    %c0_i32 = arith.constant 0 : i32
    %c0_i32_0 = arith.constant 0 : i32
    %c0_i32_1 = arith.constant 0 : i32
    return %c0_i32, %c0_i32_0 : i32, i32
  }
  func.func @transform_5(%arg0: i32, %arg1: i32) -> (i32, i32, i32) {
    %c0_i32 = arith.constant 0 : i32
    %c0_i32_0 = arith.constant 0 : i32
    return %arg0, %c0_i32, %arg1 : i32, i32, i32
  }
}

</mosaic_0001>

<bundles_post_ra>
// kernel: densenet_transition.1
= control target key start
LH: loop header
LB: loop body
LE: loop exit
PB: predicated region body
PF: predicated region fallthrough
CT: control target
= control target key end

     0   :  { %s737_s18 = smov 0   ;;  %s739_s19 = smov 0   ;;  %s835_s0 = inlined_call_operand.vmem [shape: f32[2,8,256], index: 0, kind: input, shape index: {}]   ;;  %s836_s1 = inlined_call_operand.vmem [shape: f32[8,1], index: 1, kind: input, shape index: {}]   ;;  %s837_s2 = inlined_call_operand.vmem [shape: f32[8,1], index: 2, kind: input, shape index: {}]   ;;  %s838_s3 = inlined_call_operand.vmem [shape: bf16[256,128], index: 3, kind: input, shape index: {}]   ;;  %s839_s4 = inlined_call_operand.vmem [shape: bf16[4,8], index: 4, kind: input, shape index: {}]   ;;  %s840_s5 = inlined_call_operand.vmem [shape: f32[2,4,128], index: 5, kind: output, shape index: {}]  }
   0x1   :  { %s741_s20 = smov 0  }
   0x2 LB: > { %s27_s21 = sadd.s32 1, %s698_s19  ;;  %p582_p0 = scmp.ge.s32.totalorder %s702_s20, 1  ;;  %s702_s20 = sphi %s741_s20, %s15_s20   ;;  %s698_s19 = sphi %s739_s19, %s842_s19   ;;  %s694_s18 = sphi %s737_s18, %s841_s18  }
   0x3   : > { %p29_p1 = scmp.ge.s32.totalorder %s27_s21, 2  ;;  %p208_p2 = scmp.lt.s32.totalorder %s702_s20, 3 }
   0x5   : > { %s844_s21 = smov (%p29_p1, %s27_s21), 0  ;;  %p209_p3 = pnand %p582_p0, %p208_p2 }
   0x6   : > { %v262_v0 = vld [vmem:[%s836_s1] sm:$0xff] (!%p209_p3)  ;;  %v704_v1 = vmov (!%p209_p3), 0   ;;  %v666_v5 = vld [vmem:[%s838_s3 + $0x48] sm:$0xff] (!%p209_p3)   ;;  %v668_v7 = vld [vmem:[%s838_s3 + $0x50] sm:$0xff] (!%p209_p3)   ;;  %p243_p4 = scmp.lt.s32.totalorder (!%p209_p3), %s694_s18, 1  ;;  %v705_v31 = vmov (!%p209_p3), 0.0  }
   0x7   : > { %212 = sbr.rel (%p209_p3) target bundleno = 583 (0x247), region = 40  ;;  %663 = vset.pattern.permute.xlu0 (!%p209_p3), %v704_v1  ;;  %v270_v2 = vld [vmem:[%s837_s2] sm:$0xff] (!%p209_p3)  ;;  %v667_v6 = vld [vmem:[%s838_s3 + $0x8] sm:$0xff] (!%p209_p3)   ;;  %v669_v8 = vld [vmem:[%s838_s3 + $0x10] sm:$0xff] (!%p209_p3)   ;;  %630 = vmatprep.subr.bf16.mxu1 (!%p209_p3), %v705_v31  ;;  %vm706_vm0 = vmmov (!%p209_p3), 0   ;;  %vm456_vm1 = vcmask (!%p209_p3), 1043456  }
   0x8   : > { %v664_v3 = vld [vmem:[%s838_s3 + $0x40] sm:$0xff] (!%p209_p3)   ;;  %265 = vperm.xlu0 (!%p209_p3), %663, %v262_v0   ;;  %v670_v9 = vld [vmem:[%s838_s3 + $0x58] sm:$0xff] (!%p209_p3)   ;;  %v674_v13 = vld [vmem:[%s838_s3 + $0x68] sm:$0xff] (!%p209_p3)   ;;  %632 = vmatprep.mubr.msk.bf16.mxu1 (!%p209_p3), %vm706_vm0, %v705_v31  ;;  %vm452_vm2 = vcmask (!%p209_p3), 64512  }
   0x9   : > { %v665_v4 = vld [vmem:[%s838_s3] sm:$0xff] (!%p209_p3)   ;;  %606 = vmatprep.subr.bf16.mxu0 (!%p209_p3), %v664_v3  ;;  %v671_v10 = vld [vmem:[%s838_s3 + $0x18] sm:$0xff] (!%p209_p3)   ;;  %v675_v14 = vld [vmem:[%s838_s3 + $0x28] sm:$0xff] (!%p209_p3)  }
   0xa   : > { %607 = vmatpush3.bf16.msra.mxu0 (!%p209_p3), %v665_v4  ;;  %v672_v11 = vld [vmem:[%s838_s3 + $0x60] sm:$0xff] (!%p209_p3)   ;;  %v676_v15 = vld [vmem:[%s838_s3 + $0x70] sm:$0xff] (!%p209_p3)   ;;  %v678_v17 = vld [vmem:[%s838_s3 + $0x78] sm:$0xff] (!%p209_p3)  }
   0xb   : > { %608 = vmatprep.subr.bf16.mxu0 (!%p209_p3), %v666_v5  ;;  %v673_v12 = vld [vmem:[%s838_s3 + $0x20] sm:$0xff] (!%p209_p3)   ;;  %v677_v16 = vld [vmem:[%s838_s3 + $0x30] sm:$0xff] (!%p209_p3)   ;;  %v679_v18 = vld [vmem:[%s838_s3 + $0x38] sm:$0xff] (!%p209_p3)  }
   0xc   : > { %273 = vperm.xlu0 (!%p209_p3), %663, %v270_v2   ;;  %v450_v39 = vld [vmem:[%s839_s4] sm:$0x3] (!%p209_p3) }
   0xe   : > { %609 = vmatpush3.bf16.msra.mxu0 %v667_v6  ;;  %s846_s18 = smov (!%p243_p4, %s694_s18), 1 }
   0xf   : > { %610 = vmatprep.subr.bf16.mxu0 %v668_v7  ;;  %s605_s12 = sshll.u32 %s846_s18, 4  ;;  %s585_s22 = sshll.u32 %s846_s18, 2 }
  0x10   : > { %s250_s15 = scalar_lea.vmem %s835_s0, %s605_s12  ;;  %s258_s25 = scalar_lea.vmem %s840_s5, %s585_s22 }
  0x11   : > { %v260_v20 = vld [vmem:[%s250_s15] sm:$0xff]  ;;  %v261_v21 = vld [vmem:[%s250_s15 + $0x8] sm:$0xff] }
  0x12   : > { %611 = vmatpush3.bf16.msra.mxu0 %v669_v8 }
  0x13   : > { %612 = vmatprep.subr.bf16.mxu0 %v670_v9 }
  0x16   : > { %613 = vmatpush3.bf16.msra.mxu0 %v671_v10 }
  0x17   : > { %614 = vmatprep.subr.bf16.mxu0 %v672_v11 }
  0x1a   : > { %615 = vmatpush3.bf16.msra.mxu0 %v673_v12 }
  0x1b   : > { %616 = vmatprep.subr.bf16.mxu0 %v674_v13 }
  0x1e   : > { %617 = vmatpush3.bf16.msra.mxu0 %v675_v14 }
  0x1f   : > { %618 = vmatprep.subr.bf16.mxu0 %v676_v15 }
  0x22   : > { %619 = vmatpush3.bf16.msra.mxu0 %v677_v16 }
  0x23   : > { %620 = vmatprep.subr.bf16.mxu0 %v678_v17 }
  0x26   : > { %621 = vmatpush3.bf16.msra.mxu0 %v679_v18 }
  0x87   : > { %v266_v19 = vpop.permute.xlu0 %265 }
  0x88   : > { %v268_v22 = vmul.f32 %v266_v19, %v260_v20  ;;  %v269_v23 = vmul.f32 %v266_v19, %v261_v21 }
  0x8b   : > { %v274_v24 = vpop.permute.xlu0 %273 }
  0x8c   : > { %v276_v25 = vadd.f32 %v274_v24, %v268_v22  ;;  %v277_v26 = vadd.f32 %v274_v24, %v269_v23 }
  0x8e   : > { %v278_v27 = vmax.f32 %v276_v25, 0.0  ;;  %v279_v28 = vmax.f32 %v277_v26, 0.0 }
  0x90   : > { %v280_v29 = vpack.c.bf16 %v278_v27, %v278_v27  ;;  %v281_v30 = vpack.c.bf16 %v279_v28, %v279_v28 }
  0x92   : > { %442 = vmatprep.mubr.bf16.mxu0 %v281_v30 }
  0x93   : > { %443 = vmatmul.mubr.bf16.vlgmr.msra.gmra.mrb[0].mxu0 %v280_v29 }
 0x166   : > { %v622_v32 = vpop.f32.mrb[0].mxu0 }
 0x167   : > { %v623_v33 = vpop.f32.mrb[1].mxu0 }
 0x168   : > { %v624_v34 = vadd.f32 %v623_v33, %v622_v32  ;;  %v625_v35 = vpop.f32.mrb[2].mxu0 }
 0x169   : > { %v626_v36 = vpop.f32.mrb[3].mxu0 }
 0x16a   : > { %v451_v37 = vpack.c.bf16 %v624_v34, %v624_v34 }
 0x16c   : > { %v458_v38 = vsel %vm456_vm1, %v451_v37, 0 }
 0x16d   : > { %631 = vmatpush3.bf16.msra.mxu1 %v458_v38 }
 0x170   : > { %633 = vmatmul.mubr.msk.bf16.vlgmr.msra.gmra.mrb[0].mxu1 %vm452_vm2, %v450_v39 }
 0x243   : > { %v494_v40 = vpop.f32.mrb[0].mxu1 }
 0x244   : > { %500 = vst [vmem:[%s258_s25] sm:$0xf] %v494_v40  ;;  %v634_v41 = vpop.f32.mrb[1].mxu1 }
 0x245   : > { %v497_v42 = vpop.f32.mrb[2].mxu1 }
 0x246   : > { %v635_v43 = vpop.f32.mrb[3].mxu1 }
 0x247 PF: > { %s15_s20 = sadd.s32 1, %s702_s20   ;;  %s841_s18 = smov %s698_s19 }
 0x248   : > { %p12_p5 = scmp.ge.s32.totalorder %s15_s20, 4   ;;  %s842_s19 = smov %s844_s21 }
 0x24a   :  { %14 = sbr.rel (!%p12_p5) target bundleno = 2 (0x2), region = 70 }

</bundles_post_ra>
